<compile_context>
chip_gen: v6e
topology: v6e:2x2x1
jax: 0.10.0
libtpu: 0.0.40
codegen_flags: <defaults>
</compile_context>

<pallas_src>
import jax
import jax.numpy as jnp
from jax.experimental import pallas as pl
from jax.experimental.pallas import tpu as pltpu

_LANE = 128


def _round_up(n, m):
    return ((n + m - 1) // m) * m


def _cdiv(a, b):
    return -(-a // b)


def mlp_kernel(x_ref, w1_ref, b1_ref, w2_ref, b2_ref, out_ref):
    # fc1: (TB, IN)[bf16] @ (IN, HP)[bf16] -> f32 accum; bias + ReLU in f32.
    x_bf16 = x_ref[...].astype(jnp.bfloat16)
    h = jnp.dot(x_bf16, w1_ref[...], preferred_element_type=jnp.float32)
    h = jnp.maximum(h + b1_ref[...], 0.0)

    # fc2: (TB, HP)[bf16] @ (HP, CP)[bf16] -> f32 accum; bias in f32.
    logits = jnp.dot(h.astype(jnp.bfloat16), w2_ref[...],
                     preferred_element_type=jnp.float32)
    logits = logits + b2_ref[...]  # padded classes carry -1e30 -> exp() underflows to 0

    # Numerically stable softmax over the class axis. Exact divide (not approx
    # reciprocal) so each stored row sums to 1 to f32 precision.
    m = jnp.max(logits, axis=-1, keepdims=True)
    e = jnp.exp(logits - m)
    denom = jnp.sum(e, axis=-1, keepdims=True)

    # Store only the real class columns (narrow output stream; padded classes have 0 mass).
    c = out_ref.shape[-1]
    out_ref[...] = (e[:, :c] / denom).astype(out_ref.dtype)


def prepare_params(w1, b1, w2, b2):
    """One-time parameter prep: lane-pad hidden/class dims, cast weights to bf16.

    w1: (input_size, hidden), b1: (hidden,)/(1, hidden)
    w2: (hidden, num_classes), b2: (num_classes,)/(1, num_classes)
    """
    IN, H = w1.shape
    C = w2.shape[1]
    HP = _round_up(H, _LANE)
    CP = _round_up(C, _LANE)

    w1p = jnp.zeros((IN, HP), jnp.bfloat16).at[:, :H].set(w1.astype(jnp.bfloat16))
    b1p = jnp.zeros((1, HP), jnp.float32).at[:, :H].set(
        jnp.reshape(b1, (1, H)).astype(jnp.float32))
    w2p = jnp.zeros((HP, CP), jnp.bfloat16).at[:H, :C].set(w2.astype(jnp.bfloat16))
    # Padded class logits get -1e30 so exp() is exactly 0 (no probability leakage).
    b2p = jnp.full((1, CP), -1e30, jnp.float32).at[:, :C].set(
        jnp.reshape(b2, (1, C)).astype(jnp.float32))

    return {"w1": w1p, "b1": b1p, "w2": w2p, "b2": b2p, "num_classes": C}


def neural_network_forward(x, params, *, tb=512):
    """Eval-mode forward: softmax(relu(x @ w1 + b1) @ w2 + b2, axis=1).

    x: (B, input_size) float; params from `prepare_params`. Returns (B, num_classes).
    """
    B, IN = x.shape
    w1p, b1p, w2p, b2p = params["w1"], params["b1"], params["w2"], params["b2"]
    C = params["num_classes"]
    HP = w1p.shape[1]
    CP = w2p.shape[1]

    # Batch tile: multiple of 8 (sublane), capped at tb. If that would give a single
    # grid step, split so the "parallel" batch axis has >=2 tiles (megacore on v7x).
    TB = int(min(tb, _round_up(B, 8)))
    nb = _cdiv(B, TB)
    if nb < 2 and B > 8:
        TB = int(_round_up(_cdiv(B, 2), 8))
        nb = _cdiv(B, TB)

    grid_spec = pltpu.PrefetchScalarGridSpec(
        num_scalar_prefetch=0,
        grid=(nb,),
        in_specs=[
            pl.BlockSpec((TB, IN), lambda i: (i, 0)),   # x: streamed over batch (partial last block OK)
            pl.BlockSpec((IN, HP), lambda i: (0, 0)),   # w1: resident across grid steps
            pl.BlockSpec((1, HP), lambda i: (0, 0)),    # b1: resident
            pl.BlockSpec((HP, CP), lambda i: (0, 0)),   # w2: resident
            pl.BlockSpec((1, CP), lambda i: (0, 0)),    # b2: resident
        ],
        # Output block last dim == full array dim C (legal even though C < 128);
        # only real class columns hit HBM.
        out_specs=pl.BlockSpec((TB, C), lambda i: (i, 0)),
    )

    return pl.pallas_call(
        mlp_kernel,
        out_shape=jax.ShapeDtypeStruct((B, C), x.dtype),
        grid_spec=grid_spec,
        compiler_params=pltpu.CompilerParams(
            dimension_semantics=("parallel",),  # batch tiles shard across TCs (v7x)
        ),
    )(x, w1p, b1p, w2p, b2p)


if __name__ == "__main__":
    # Small shapes consistent with the module: input=32, hidden=64, classes=16.
    # B=256 with tb=128 exercises a 2-step pipelined, batch-parallel grid.
    B, IN, H, C = 256, 32, 64, 16

    key = jax.random.PRNGKey(0)
    kx, k1, k2, k3, k4 = jax.random.split(key, 5)

    x = jax.random.normal(kx, (B, IN), dtype=jnp.float32)
    # PyTorch Linear-style uniform init; weights stored pre-transposed as (in, out).
    bound1 = 1.0 / (IN ** 0.5)
    w1 = jax.random.uniform(k1, (IN, H), minval=-bound1, maxval=bound1, dtype=jnp.float32)
    b1 = jax.random.uniform(k2, (H,), minval=-bound1, maxval=bound1, dtype=jnp.float32)
    bound2 = 1.0 / (H ** 0.5)
    w2 = jax.random.uniform(k3, (H, C), minval=-bound2, maxval=bound2, dtype=jnp.float32)
    b2 = jax.random.uniform(k4, (C,), minval=-bound2, maxval=bound2, dtype=jnp.float32)

    params = prepare_params(w1, b1, w2, b2)   # one-time prep (hoisted out of forward)
    out = neural_network_forward(x, params, tb=128)
    jax.block_until_ready(out)

    # Sanity check against pure-JAX f32 reference (eval-mode forward).
    ref = jax.nn.softmax(jnp.maximum(x @ w1 + b1[None, :], 0.0) @ w2 + b2[None, :], axis=1)
    assert out.shape == (B, C)
    # bf16 matmul operands: post-softmax error is well below 1e-2.
    assert jnp.allclose(out, ref, atol=1e-2, rtol=1e-2), float(jnp.max(jnp.abs(out - ref)))
    # Exact divide in the kernel -> rows sum to 1 to f32 precision.
    assert jnp.allclose(jnp.sum(out, axis=1), 1.0, atol=1e-3)

    print("KERNEL_OK")
</pallas_src>

<mosaic_0001>
module attributes {stable_mosaic.version = 11 : i64} {
  func.func @mlp_kernel(%arg0: i32, %arg1: memref<128x32xf32, #tpu.memory_space<vmem>>, %arg2: memref<32x128xbf16, #tpu.memory_space<vmem>>, %arg3: memref<1x128xf32, #tpu.memory_space<vmem>>, %arg4: memref<128x128xbf16, #tpu.memory_space<vmem>>, %arg5: memref<1x128xf32, #tpu.memory_space<vmem>>, %arg6: memref<128x16xf32, #tpu.memory_space<vmem>>) attributes {dimension_semantics = [#tpu.dimension_semantics<parallel>], iteration_bounds = array<i64: 2>, scalar_prefetch = 0 : i64, scratch_operands = 0 : i64, tpu.core_type = #tpu.core_type<tc>, window_params = [{transform_indices = @transform_0, window_bounds = array<i64: 128, 32>}, {pipeline_mode = #tpu.pipeline_mode<synchronous>, transform_indices = @transform_1, window_bounds = array<i64: 32, 128>}, {pipeline_mode = #tpu.pipeline_mode<synchronous>, transform_indices = @transform_2, window_bounds = array<i64: 1, 128>}, {pipeline_mode = #tpu.pipeline_mode<synchronous>, transform_indices = @transform_3, window_bounds = array<i64: 128, 128>}, {pipeline_mode = #tpu.pipeline_mode<synchronous>, transform_indices = @transform_4, window_bounds = array<i64: 1, 128>}, {transform_indices = @transform_5, window_bounds = array<i64: 128, 16>}]} {
    %c0 = arith.constant 0 : index
    %c0_0 = arith.constant 0 : index
    %0 = vector.load %arg1[%c0, %c0_0] : memref<128x32xf32, #tpu.memory_space<vmem>>, vector<128x32xf32>
    %1 = arith.truncf %0 : vector<128x32xf32> to vector<128x32xbf16>
    %c0_1 = arith.constant 0 : index
    %c0_2 = arith.constant 0 : index
    %2 = vector.load %arg2[%c0_1, %c0_2] : memref<32x128xbf16, #tpu.memory_space<vmem>>, vector<32x128xbf16>
    %cst = arith.constant dense<0.000000e+00> : vector<128x128xf32>
    %3 = tpu.matmul %1, %2, %cst {dimension_numbers = #tpu.dot_dimension_numbers<[1], [0], [0], [1], [0, 0, 1, 1], [], []>} : vector<128x32xbf16>, vector<32x128xbf16>, vector<128x128xf32> -> vector<128x128xf32>
    %c0_3 = arith.constant 0 : index
    %c0_4 = arith.constant 0 : index
    %4 = vector.load %arg3[%c0_3, %c0_4] : memref<1x128xf32, #tpu.memory_space<vmem>>, vector<1x128xf32>
    %5 = vector.broadcast %4 : vector<1x128xf32> to vector<128x128xf32>
    %6 = arith.addf %3, %5 : vector<128x128xf32>
    %cst_5 = arith.constant 0.000000e+00 : f32
    %7 = vector.broadcast %cst_5 : f32 to vector<128x128xf32>
    %8 = arith.maximumf %6, %7 : vector<128x128xf32>
    %9 = arith.truncf %8 : vector<128x128xf32> to vector<128x128xbf16>
    %c0_6 = arith.constant 0 : index
    %c0_7 = arith.constant 0 : index
    %10 = vector.load %arg4[%c0_6, %c0_7] : memref<128x128xbf16, #tpu.memory_space<vmem>>, vector<128x128xbf16>
    %cst_8 = arith.constant dense<0.000000e+00> : vector<128x128xf32>
    %11 = tpu.matmul %9, %10, %cst_8 {dimension_numbers = #tpu.dot_dimension_numbers<[1], [0], [0], [1], [0, 0, 1, 1], [], []>} : vector<128x128xbf16>, vector<128x128xbf16>, vector<128x128xf32> -> vector<128x128xf32>
    %c0_9 = arith.constant 0 : index
    %c0_10 = arith.constant 0 : index
    %12 = vector.load %arg5[%c0_9, %c0_10] : memref<1x128xf32, #tpu.memory_space<vmem>>, vector<1x128xf32>
    %13 = vector.broadcast %12 : vector<1x128xf32> to vector<128x128xf32>
    %14 = arith.addf %11, %13 : vector<128x128xf32>
    %cst_11 = arith.constant dense<0xFF800000> : vector<128xf32>
    %15 = vector.multi_reduction <maximumf>, %14, %cst_11 [1] : vector<128x128xf32> to vector<128xf32>
    %16 = vector.shape_cast %15 : vector<128xf32> to vector<128x1xf32>
    %17 = vector.broadcast %16 : vector<128x1xf32> to vector<128x128xf32>
    %18 = arith.subf %14, %17 : vector<128x128xf32>
    %19 = math.exp %18 : vector<128x128xf32>
    %cst_12 = arith.constant dense<0.000000e+00> : vector<128xf32>
    %20 = vector.multi_reduction <add>, %19, %cst_12 [1] : vector<128x128xf32> to vector<128xf32>
    %21 = vector.shape_cast %20 : vector<128xf32> to vector<128x1xf32>
    %22 = vector.extract_strided_slice %19 {offsets = [0, 0], sizes = [128, 16], strides = [1, 1]} : vector<128x128xf32> to vector<128x16xf32>
    %23 = vector.broadcast %21 : vector<128x1xf32> to vector<128x16xf32>
    %24 = arith.divf %22, %23 : vector<128x16xf32>
    %c0_13 = arith.constant 0 : index
    %c0_14 = arith.constant 0 : index
    %25 = vector.load %arg6[%c0_13, %c0_14] : memref<128x16xf32, #tpu.memory_space<vmem>>, vector<128x16xf32>
    tpu.vector_store %arg6[%c0_13, %c0_14], %24 {strides = array<i32>} : memref<128x16xf32, #tpu.memory_space<vmem>>, vector<128x16xf32>,
    return
  }
  func.func @transform_0(%arg0: i32) -> (i32, i32) {
    %c0_i32 = arith.constant 0 : i32
    %c0_i32_0 = arith.constant 0 : i32
    return %arg0, %c0_i32 : i32, i32
  }
  func.func @transform_1(%arg0: i32) -> (i32, i32) {
    %c0_i32 = arith.constant 0 : i32
    %c0_i32_0 = arith.constant 0 : i32
    %c0_i32_1 = arith.constant 0 : i32
    return %c0_i32, %c0_i32_0 : i32, i32
  }
  func.func @transform_2(%arg0: i32) -> (i32, i32) {
    %c0_i32 = arith.constant 0 : i32
    %c0_i32_0 = arith.constant 0 : i32
    %c0_i32_1 = arith.constant 0 : i32
    return %c0_i32, %c0_i32_0 : i32, i32
  }
  func.func @transform_3(%arg0: i32) -> (i32, i32) {
    %c0_i32 = arith.constant 0 : i32
    %c0_i32_0 = arith.constant 0 : i32
    %c0_i32_1 = arith.constant 0 : i32
    return %c0_i32, %c0_i32_0 : i32, i32
  }
  func.func @transform_4(%arg0: i32) -> (i32, i32) {
    %c0_i32 = arith.constant 0 : i32
    %c0_i32_0 = arith.constant 0 : i32
    %c0_i32_1 = arith.constant 0 : i32
    return %c0_i32, %c0_i32_0 : i32, i32
  }
  func.func @transform_5(%arg0: i32) -> (i32, i32) {
    %c0_i32 = arith.constant 0 : i32
    %c0_i32_0 = arith.constant 0 : i32
    return %arg0, %c0_i32 : i32, i32
  }
}

</mosaic_0001>

<bundles_post_ra>
// kernel: tpu_custom_call.1
= control target key start
LH: loop header
LB: loop body
LE: loop exit
PB: predicated region body
PF: predicated region fallthrough
CT: control target
= control target key end

     0   :  { %s1052_s18 = smov 0   ;;  %s1264_s0 = inlined_call_operand.vmem [shape: f32[256,32], index: 0, kind: input, shape index: {}]   ;;  %s1265_s1 = inlined_call_operand.vmem [shape: bf16[32,128], index: 1, kind: input, shape index: {}]   ;;  %s1266_s2 = inlined_call_operand.vmem [shape: f32[1,128], index: 2, kind: input, shape index: {}]   ;;  %s1267_s3 = inlined_call_operand.vmem [shape: bf16[128,128], index: 3, kind: input, shape index: {}]   ;;  %s1268_s4 = inlined_call_operand.vmem [shape: f32[1,128], index: 4, kind: input, shape index: {}]   ;;  %s1269_s5 = inlined_call_operand.vmem [shape: f32[256,16], index: 5, kind: output, shape index: {}]  }
   0x1 LB: > { %s807_s19 = sadd.s32 4294967295, %s1020_s18   ;;  %p811_p0 = scmp.ge.s32.totalorder %s1020_s18, 1  ;;  %s1020_s18 = sphi %s1052_s18, %s15_s18  }
   0x2   : > { %p188_p1 = scmp.lt.s32.totalorder %s1020_s18, 3 }
   0x4   : > { %p189_p2 = pnand %p811_p0, %p188_p1 }
   0x5   : > { %s812_s22 = sshll.u32 (!%p189_p2), %s807_s19, 4 }
   0x6   : > { %192 = sbr.rel (%p189_p2) target bundleno = 766 (0x2fe), region = 40  ;;  %p217_p3 = scmp.lt.s32.totalorder (!%p189_p2), %s812_s22, 31 }
   0xb   : > { %v940_v0 = vld [vmem:[%s1265_s1 + $0x8] sm:$0xff]   ;;  %v941_v1 = vld [vmem:[%s1265_s1] sm:$0xff]   ;;  %v942_v2 = vld [vmem:[%s1267_s3 + $0x38] sm:$0xff]   ;;  %s1271_s22 = smov (!%p217_p3, %s812_s22), 31  ;;  %vm276_vm0 = vcmask 261120   ;;  %vm734_vm1 = vcmask 130048  }
   0xc   : > { %864 = vmatprep.subr.bf16.mxu0 %v940_v0  ;;  %v943_v3 = vld [vmem:[%s1267_s3 + $0x30] sm:$0xff]   ;;  %916 = vmatprep.subr.bf16.mxu1 %v942_v2  ;;  %s813_s29 = sshll.u32 %s1271_s22, 3  ;;  %v944_v4 = vld [vmem:[%s1267_s3 + $0x28] sm:$0xff]   ;;  %v945_v14 = vld [vmem:[%s1267_s3 + $0x20] sm:$0xff]  }
   0xd   : > { %865 = vmatpush3.bf16.msra.mxu0 %v940_v0  ;;  %924 = vmatpush3.bf16.msra.mxu1 %v942_v2  ;;  %s1080_s7 = scalar_lea.vmem %s1264_s0, %s813_s29  ;;  %v946_v21 = vld [vmem:[%s1267_s3 + $0x18] sm:$0xff]   ;;  %v947_v31 = vld [vmem:[%s1267_s3 + $0x10] sm:$0xff]   ;;  %v948_v32 = vld [vmem:[%s1267_s3 + $0x8] sm:$0xff]   ;;  %s1211_s28 = scalar_lea.vmem %s1269_s5, %s813_s29 }
   0xe   : > { %866 = vmatprep.subr.bf16.mxu0 %v941_v1  ;;  %917 = vmatprep.subr.bf16.mxu1 %v943_v3  ;;  %v229_v5 = vld [vmem:[%s1080_s7] sm:$0xff]  ;;  %v230_v6 = vld [vmem:[%s1080_s7 + $0x8] sm:$0xff]  ;;  %v231_v7 = vld [vmem:[%s1080_s7 + $0x10] sm:$0xff] }
   0xf   : > { %v245_v8 = vpack.c.bf16 %v230_v6, %v229_v5  ;;  %v232_v9 = vld [vmem:[%s1080_s7 + $0x18] sm:$0xff]  ;;  %v233_v10 = vld [vmem:[%s1080_s7 + $0x20] sm:$0xff]  ;;  %v234_v11 = vld [vmem:[%s1080_s7 + $0x28] sm:$0xff] }
  0x10   : > { %v246_v12 = vpack.c.bf16 %v232_v9, %v231_v7  ;;  %v247_v13 = vpack.c.bf16 %v234_v11, %v233_v10  ;;  %v235_v15 = vld [vmem:[%s1080_s7 + $0x30] sm:$0xff]  ;;  %v236_v16 = vld [vmem:[%s1080_s7 + $0x38] sm:$0xff]  ;;  %v237_v17 = vld [vmem:[%s1080_s7 + $0x40] sm:$0xff] }
  0x11   : > { %867 = vmatpush3.bf16.msra.mxu0 %v941_v1  ;;  %925 = vmatpush3.bf16.msra.mxu1 %v943_v3  ;;  %v238_v18 = vld [vmem:[%s1080_s7 + $0x48] sm:$0xff]  ;;  %v248_v19 = vpack.c.bf16 %v236_v16, %v235_v15  ;;  %v239_v22 = vld [vmem:[%s1080_s7 + $0x50] sm:$0xff]  ;;  %v240_v23 = vld [vmem:[%s1080_s7 + $0x58] sm:$0xff] }
  0x12   : > { %884 = vmatprep.subr.bf16.mxu0 %v942_v2  ;;  %868 = vmatprep.mubr.msk.bf16.mxu0 %vm276_vm0, %v245_v8  ;;  %v249_v20 = vpack.c.bf16 %v238_v18, %v237_v17  ;;  %v241_v24 = vld [vmem:[%s1080_s7 + $0x60] sm:$0xff]  ;;  %v242_v25 = vld [vmem:[%s1080_s7 + $0x68] sm:$0xff]  ;;  %v250_v26 = vpack.c.bf16 %v240_v23, %v239_v22  ;;  %v243_v28 = vld [vmem:[%s1080_s7 + $0x70] sm:$0xff] }
  0x13   : > { %918 = vmatprep.subr.bf16.mxu1 %v944_v4  ;;  %v251_v27 = vpack.c.bf16 %v242_v25, %v241_v24  ;;  %v244_v29 = vld [vmem:[%s1080_s7 + $0x78] sm:$0xff]  ;;  %v949_v33 = vld [vmem:[%s1267_s3] sm:$0xff]  }
  0x14   : > { %869 = vmatmul.mubr.msk.bf16.vlgmr.msra.gmra.mxu0 %vm276_vm0, %v246_v12  ;;  %v252_v30 = vpack.c.bf16 %v244_v29, %v243_v28  ;;  %v816_v36 = vld [vmem:[%s1266_s2] ss:$0 sm:$0xff] }
  0x15   : > { %872 = vmatprep.mubr.msk.bf16.mxu0 %vm276_vm0, %v247_v13  ;;  %885 = vmatpush3.bf16.msra.mxu0 %v942_v2 }
  0x16   : > { %886 = vmatprep.subr.bf16.mxu0 %v943_v3  ;;  %926 = vmatpush3.bf16.msra.mxu1 %v944_v4 }
  0x17   : > { %919 = vmatprep.subr.bf16.mxu1 %v945_v14 }
  0x19   : > { %887 = vmatpush3.bf16.msra.mxu0 %v943_v3 }
  0x1a   : > { %888 = vmatprep.subr.bf16.mxu0 %v944_v4  ;;  %927 = vmatpush3.bf16.msra.mxu1 %v945_v14 }
  0x1b   : > { %920 = vmatprep.subr.bf16.mxu1 %v946_v21 }
  0x1c   : > { %873 = vmatmul.mubr.msk.bf16.gmra.mxu0 %vm276_vm0, %v248_v19 }
  0x1d   : > { %876 = vmatprep.mubr.msk.bf16.mxu0 %vm276_vm0, %v249_v20  ;;  %889 = vmatpush3.bf16.msra.mxu0 %v944_v4 }
  0x1e   : > { %890 = vmatprep.subr.bf16.mxu0 %v945_v14  ;;  %928 = vmatpush3.bf16.msra.mxu1 %v946_v21 }
  0x1f   : > { %921 = vmatprep.subr.bf16.mxu1 %v947_v31 }
  0x21   : > { %891 = vmatpush3.bf16.msra.mxu0 %v945_v14 }
  0x22   : > { %892 = vmatprep.subr.bf16.mxu0 %v946_v21  ;;  %929 = vmatpush3.bf16.msra.mxu1 %v947_v31 }
  0x23   : > { %922 = vmatprep.subr.bf16.mxu1 %v948_v32 }
  0x24   : > { %877 = vmatmul.mubr.msk.bf16.gmra.mxu0 %vm276_vm0, %v250_v26 }
  0x25   : > { %880 = vmatprep.mubr.msk.bf16.mxu0 %vm276_vm0, %v251_v27  ;;  %893 = vmatpush3.bf16.msra.mxu0 %v946_v21  ;;  %v827_v27 = vld [vmem:[%s1268_s4] ss:$0 sm:$0xff] }
  0x26   : > { %894 = vmatprep.subr.bf16.mxu0 %v947_v31  ;;  %930 = vmatpush3.bf16.msra.mxu1 %v948_v32 }
  0x27   : > { %923 = vmatprep.subr.bf16.mxu1 %v949_v33 }
  0x29   : > { %895 = vmatpush3.bf16.msra.mxu0 %v947_v31 }
  0x2a   : > { %896 = vmatprep.subr.bf16.mxu0 %v948_v32  ;;  %931 = vmatpush3.bf16.msra.mxu1 %v949_v33 }
  0x2c   : > { %881 = vmatmul.mubr.msk.bf16.gmra.mxu0 %vm276_vm0, %v252_v30 }
  0x2d   : > { %897 = vmatpush3.bf16.msra.mxu0 %v948_v32 }
  0x2e   : > { %898 = vmatprep.subr.bf16.mxu0 %v949_v33 }
  0x31   : > { %899 = vmatpush3.bf16.msra.mxu0 %v949_v33 }
  0xd4   : > { %v870_v34 = vpop.f32.mrf.mxu0 }
  0xd5   : > { %v344_v40 = vadd.f32 %v870_v34, %v816_v36 }
  0xd6   : > { %v335_v35 = vpop.f32.mrf.mxu0 }
  0xd7   : > { %v336_v38 = vadd.f32 %v816_v36, %v335_v35  ;;  %v400_v47 = vmax.f32 %v344_v40, 0.0 }
  0xd8   : > { %v871_v37 = vpop.f32.mrf.mxu0 }
  0xd9   : > { %v347_v39 = vadd.f32 %v871_v37, %v816_v36  ;;  %v398_v45 = vmax.f32 %v336_v38, 0.0 }
  0xda   : > { %v338_v41 = vpop.f32.mrf.mxu0 }
  0xdb   : > { %v339_v42 = vadd.f32 %v816_v36, %v338_v41  ;;  %v401_v43 = vmax.f32 %v347_v39, 0.0 }
  0xdc   : > { %v874_v44 = vpop.f32.mrf.mxu0 }
  0xdd   : > { %v399_v46 = vmax.f32 %v339_v42, 0.0  ;;  %v415_v50 = vpack.c.bf16 %v401_v43, %v400_v47  ;;  %v360_v54 = vadd.f32 %v874_v44, %v816_v36 }
  0xde   : > { %v351_v48 = vpop.f32.mrf.mxu0 }
  0xdf   : > { %v414_v49 = vpack.c.bf16 %v399_v46, %v398_v45  ;;  %v352_v52 = vadd.f32 %v816_v36, %v351_v48  ;;  %v404_v61 = vmax.f32 %v360_v54, 0.0 }
  0xe0   : > { %v875_v51 = vpop.f32.mrf.mxu0 }
  0xe1   : > { %v363_v53 = vadd.f32 %v875_v51, %v816_v36  ;;  %900 = vmatprep.mubr.bf16.mxu0 %v414_v49  ;;  %v402_v59 = vmax.f32 %v352_v52, 0.0 }
  0xe2   : > { %v354_v55 = vpop.f32.mrf.mxu0  ;;  %901 = vmatmul.mubr.bf16.vlgmr.msra.gmra.mxu0 %v415_v50 }
  0xe3   : > { %v355_v56 = vadd.f32 %v816_v36, %v354_v55  ;;  %v405_v57 = vmax.f32 %v363_v53, 0.0 }
  0xe4   : > { %v878_v58 = vpop.f32.mrf.mxu0 }
  0xe5   : > { %v403_v60 = vmax.f32 %v355_v56, 0.0  ;;  %v417_v0 = vpack.c.bf16 %v405_v57, %v404_v61  ;;  %v376_v4 = vadd.f32 %v878_v58, %v816_v36 }
  0xe6   : > { %v367_v62 = vpop.f32.mrf.mxu0 }
  0xe7   : > { %v416_v63 = vpack.c.bf16 %v403_v60, %v402_v59  ;;  %v368_v2 = vadd.f32 %v816_v36, %v367_v62  ;;  %v408_v11 = vmax.f32 %v376_v4, 0.0 }
  0xe8   : > { %v879_v1 = vpop.f32.mrf.mxu0 }
  0xe9   : > { %v379_v3 = vadd.f32 %v879_v1, %v816_v36  ;;  %904 = vmatprep.mubr.bf16.mxu1 %v416_v63  ;;  %v406_v9 = vmax.f32 %v368_v2, 0.0 }
  0xea   : > { %v370_v5 = vpop.f32.mrf.mxu0  ;;  %905 = vmatmul.mubr.bf16.vlgmr.msra.gmra.mxu1 %v417_v0 }
  0xeb   : > { %v371_v6 = vadd.f32 %v816_v36, %v370_v5  ;;  %v409_v7 = vmax.f32 %v379_v3, 0.0 }
  0xec   : > { %v882_v8 = vpop.f32.mrf.mxu0 }
  0xed   : > { %v407_v10 = vmax.f32 %v371_v6, 0.0  ;;  %v419_v14 = vpack.c.bf16 %v409_v7, %v408_v11  ;;  %v392_v18 = vadd.f32 %v882_v8, %v816_v36 }
  0xee   : > { %v383_v12 = vpop.f32.mrf.mxu0 }
  0xef   : > { %v418_v13 = vpack.c.bf16 %v407_v10, %v406_v9  ;;  %v384_v16 = vadd.f32 %v816_v36, %v383_v12  ;;  %v412_v24 = vmax.f32 %v392_v18, 0.0 }
  0xf0   : > { %v883_v15 = vpop.f32.mrf.mxu0 }
  0xf1   : > { %v395_v17 = vadd.f32 %v883_v15, %v816_v36  ;;  %908 = vmatprep.mubr.bf16.mxu1 %v418_v13  ;;  %v410_v22 = vmax.f32 %v384_v16, 0.0 }
  0xf2   : > { %v386_v19 = vpop.f32.mrf.mxu0  ;;  %909 = vmatmul.mubr.bf16.gmra.mxu1 %v419_v14 }
  0xf3   : > { %v387_v20 = vadd.f32 %v816_v36, %v386_v19  ;;  %v413_v21 = vmax.f32 %v395_v17, 0.0 }
  0xf5   : > { %v411_v23 = vmax.f32 %v387_v20, 0.0  ;;  %v421_v26 = vpack.c.bf16 %v413_v21, %v412_v24 }
  0xf7   : > { %v420_v25 = vpack.c.bf16 %v411_v23, %v410_v22 }
  0xf9   : > { %912 = vmatprep.mubr.bf16.mxu1 %v420_v25 }
  0xfa   : > { %913 = vmatmul.mubr.bf16.gmra.mxu1 %v421_v26 }
 0x1a2   : > { %v902_v28 = vpop.f32.mrf.mxu0 }
 0x1a3   : > { %v536_v29 = vadd.f32 %v902_v28, %v827_v27 }
 0x1a4   : > { %v527_v30 = vpop.f32.mrf.mxu0 }
 0x1a5   : > { %v528_v31 = vadd.f32 %v827_v27, %v527_v30  ;;  %594 = vmax.xlane.f32.xlu1 %v536_v29 }
 0x1a6   : > { %v903_v32 = vpop.f32.mrf.mxu0 }
 0x1a7   : > { %v539_v33 = vadd.f32 %v903_v32, %v827_v27  ;;  %590 = vmax.xlane.f32.xlu0 %v528_v31 }
 0x1a8   : > { %v530_v34 = vpop.f32.mrf.mxu0 }
 0x1a9   : > { %v531_v35 = vadd.f32 %v827_v27, %v530_v34  ;;  %596 = vmax.xlane.f32.xlu1 %v539_v33 }
 0x1aa   : > { %v906_v36 = vpop.f32.mrf.mxu1 }
 0x1ab   : > { %592 = vmax.xlane.f32.xlu0 %v531_v35  ;;  %v552_v38 = vadd.f32 %v906_v36, %v827_v27 }
 0x1ac   : > { %v543_v37 = vpop.f32.mrf.mxu1 }
 0x1ad   : > { %v544_v42 = vadd.f32 %v827_v27, %v543_v37 }
 0x1ae   : > { %v907_v39 = vpop.f32.mrf.mxu1 }
 0x1af   : > { %v555_v40 = vadd.f32 %v907_v39, %v827_v27  ;;  %602 = vmax.xlane.f32.xlu0 %v552_v38 }
 0x1b0   : > { %v546_v41 = vpop.f32.mrf.mxu1 }
 0x1b1   : > { %604 = vmax.xlane.f32.xlu1 %v555_v40  ;;  %v547_v44 = vadd.f32 %v827_v27, %v546_v41 }
 0x1b2   : > { %v910_v43 = vpop.f32.mrf.mxu1 }
 0x1b3   : > { %598 = vmax.xlane.f32.xlu0 %v544_v42  ;;  %v568_v46 = vadd.f32 %v910_v43, %v827_v27 }
 0x1b4   : > { %v559_v45 = vpop.f32.mrf.mxu1 }
 0x1b5   : > { %600 = vmax.xlane.f32.xlu1 %v547_v44  ;;  %v1132_v50 = vadd.f32 %v827_v27, %v559_v45 }
 0x1b6   : > { %v911_v47 = vpop.f32.mrf.mxu1 }
 0x1b7   : > { %v1130_v48 = vadd.f32 %v911_v47, %v827_v27  ;;  %610 = vmax.xlane.f32.xlu0 %v568_v46 }
 0x1b8   : > { %v562_v49 = vpop.f32.mrf.mxu1 }
 0x1b9   : > { %612 = vmax.xlane.f32.xlu1 %v1130_v48  ;;  %v1135_v52 = vadd.f32 %v827_v27, %v562_v49 }
 0x1ba   : > { %v914_v51 = vpop.f32.mrf.mxu1 }
 0x1bb   : > { %606 = vmax.xlane.f32.xlu0 %v1132_v50  ;;  %v1142_v57 = vadd.f32 %v914_v51, %v827_v27 }
 0x1bc   : > { %v575_v53 = vpop.f32.mrf.mxu1 }
 0x1bd   : > { %v1138_v54 = vadd.f32 %v827_v27, %v575_v53  ;;  %608 = vmax.xlane.f32.xlu1 %v1135_v52 }
 0x1be   : > { %v915_v55 = vpop.f32.mrf.mxu1 }
 0x1bf   : > { %614 = vmax.xlane.f32.xlu0 %v1138_v54  ;;  %v1148_v59 = vadd.f32 %v915_v55, %v827_v27 }
 0x1c0   : > { %v578_v56 = vpop.f32.mrf.mxu1 }
 0x1c1   : > { %v1144_v58 = vadd.f32 %v827_v27, %v578_v56 }
 0x1c3   : > { %616 = vmax.xlane.f32.xlu1 %v1144_v58  ;;  %618 = vmax.xlane.f32.xlu0 %v1142_v57 }
 0x1c7   : > { %620 = vmax.xlane.f32.xlu1 %v1148_v59 }
 0x22e   : > { %v595_v60 = vpop.xlane.xlu1 %594 }
 0x22f   : > { %v624_v61 = vsub.f32 %v536_v29, %v595_v60 }
 0x230   : > { %v591_v62 = vpop.xlane.xlu0 %590 }
 0x231   : > { %v642_v63 = vmul.f32 1.442695, %v624_v61  ;;  %v622_v0 = vsub.f32 %v528_v31, %v591_v62 }
 0x232   : > { %v597_v1 = vpop.xlane.xlu1 %596 }
 0x233   : > { %950 = vpow2.f32 %v642_v63  ;;  %v638_v2 = vmul.f32 1.442695, %v622_v0  ;;  %v625_v3 = vsub.f32 %v539_v33, %v597_v1 }
 0x234   : > { %v593_v4 = vpop.xlane.xlu0 %592 }
 0x235   : > { %v644_v5 = vmul.f32 1.442695, %v625_v3  ;;  %v623_v6 = vsub.f32 %v531_v35, %v593_v4  ;;  %952 = vpow2.f32 %v638_v2 }
 0x237   : > { %954 = vpow2.f32 %v644_v5  ;;  %v640_v7 = vmul.f32 1.442695, %v623_v6 }
 0x238   : > { %v603_v8 = vpop.xlane.xlu0 %602 }
 0x239   : > { %v628_v9 = vsub.f32 %v552_v38, %v603_v8  ;;  %956 = vpow2.f32 %v640_v7 }
 0x23a   : > { %v605_v10 = vpop.xlane.xlu1 %604 }
 0x23b   : > { %v650_v11 = vmul.f32 1.442695, %v628_v9  ;;  %v629_v12 = vsub.f32 %v555_v40, %v605_v10 }
 0x23c   : > { %v599_v13 = vpop.xlane.xlu0 %598 }
 0x23d   : > { %958 = vpow2.f32 %v650_v11  ;;  %v652_v14 = vmul.f32 1.442695, %v629_v12  ;;  %v626_v15 = vsub.f32 %v544_v42, %v599_v13 }
 0x23e   : > { %v601_v16 = vpop.xlane.xlu1 %600 }
 0x23f   : > { %960 = vpow2.f32 %v652_v14  ;;  %v646_v17 = vmul.f32 1.442695, %v626_v15  ;;  %v627_v18 = vsub.f32 %v547_v44, %v601_v16 }
 0x240   : > { %v1151_v19 = vpop.eup %950  ;;  %v611_v20 = vpop.xlane.xlu0 %610 }
 0x241   : > { %962 = vpow2.f32 %v646_v17  ;;  %v648_v21 = vmul.f32 1.442695, %v627_v18  ;;  %v632_v22 = vsub.f32 %v568_v46, %v611_v20  ;;  %674 = vadd.xlane.f32.xlu0 %v1151_v19 }
 0x242   : > { %v613_v23 = vpop.xlane.xlu1 %612  ;;  %v1154_v24 = vpop.eup %952 }
 0x243   : > { %964 = vpow2.f32 %v648_v21  ;;  %v658_v25 = vmul.f32 1.442695, %v632_v22  ;;  %v633_v26 = vsub.f32 %v1130_v48, %v613_v23 }
 0x244   : > { %v1157_v27 = vpop.eup %954  ;;  %v607_v28 = vpop.xlane.xlu0 %606 }
 0x245   : > { %966 = vpow2.f32 %v658_v25  ;;  %v660_v29 = vmul.f32 1.442695, %v633_v26  ;;  %v630_v30 = vsub.f32 %v1132_v50, %v607_v28  ;;  %676 = vadd.xlane.f32.xlu1 %v1157_v27  ;;  %670 = vadd.xlane.f32.xlu0 %v1154_v24 }
 0x246   : > { %v609_v31 = vpop.xlane.xlu1 %608  ;;  %v1163_v34 = vpop.eup %956 }
 0x247   : > { %968 = vpow2.f32 %v660_v29  ;;  %v654_v32 = vmul.f32 1.442695, %v630_v30  ;;  %v631_v33 = vsub.f32 %v1135_v52, %v609_v31 }
 0x248   : > { %v615_v35 = vpop.xlane.xlu0 %614 }
 0x249   : > { %970 = vpow2.f32 %v654_v32  ;;  %v656_v36 = vmul.f32 1.442695, %v631_v33  ;;  %v634_v37 = vsub.f32 %v1138_v54, %v615_v35  ;;  %672 = vadd.xlane.f32.xlu1 %v1163_v34 }
 0x24a   : > { %v1167_v38 = vpop.eup %958 }
 0x24b   : > { %972 = vpow2.f32 %v656_v36  ;;  %v662_v39 = vmul.f32 1.442695, %v634_v37  ;;  %682 = vadd.xlane.f32.xlu0 %v1167_v38 }
 0x24c   : > { %v1170_v40 = vpop.eup %960  ;;  %v617_v41 = vpop.xlane.xlu1 %616 }
 0x24d   : > { %v619_v42 = vpop.xlane.xlu0 %618  ;;  %974 = vpow2.f32 %v662_v39  ;;  %v635_v43 = vsub.f32 %v1144_v58, %v617_v41  ;;  %684 = vadd.xlane.f32.xlu1 %v1170_v40 }
 0x24e   : > { %v636_v44 = vsub.f32 %v1142_v57, %v619_v42  ;;  %v1175_v45 = vpop.eup %962 }
 0x24f   : > { %v664_v46 = vmul.f32 1.442695, %v635_v43  ;;  %678 = vadd.xlane.f32.xlu0 %v1175_v45 }
 0x250   : > { %v666_v47 = vmul.f32 1.442695, %v636_v44  ;;  %v1178_v48 = vpop.eup %964  ;;  %v621_v49 = vpop.xlane.xlu1 %620 }
 0x251   : > { %976 = vpow2.f32 %v664_v46  ;;  %v637_v50 = vsub.f32 %v1148_v59, %v621_v49  ;;  %680 = vadd.xlane.f32.xlu1 %v1178_v48 }
 0x252   : > { %v1182_v51 = vpop.eup %966  ;;  %978 = vpow2.f32 %v666_v47 }
 0x253   : > { %v668_v52 = vmul.f32 1.442695, %v637_v50  ;;  %690 = vadd.xlane.f32.xlu0 %v1182_v51 }
 0x254   : > { %v1185_v53 = vpop.eup %968 }
 0x255   : > { %980 = vpow2.f32 %v668_v52  ;;  %692 = vadd.xlane.f32.xlu1 %v1185_v53 }
 0x256   : > { %v1188_v54 = vpop.eup %970 }
 0x257   : > { %686 = vadd.xlane.f32.xlu0 %v1188_v54 }
 0x258   : > { %v1191_v55 = vpop.eup %972 }
 0x259   : > { %688 = vadd.xlane.f32.xlu1 %v1191_v55 }
 0x25a   : > { %v1194_v56 = vpop.eup %974 }
 0x25b   : > { %694 = vadd.xlane.f32.xlu0 %v1194_v56 }
 0x25e   : > { %v1197_v57 = vpop.eup %976 }
 0x25f   : > { %v1199_v58 = vpop.eup %978  ;;  %696 = vadd.xlane.f32.xlu1 %v1197_v57 }
 0x260   : > { %698 = vadd.xlane.f32.xlu0 %v1199_v58 }
 0x262   : > { %v1203_v59 = vpop.eup %980 }
 0x263   : > { %700 = vadd.xlane.f32.xlu1 %v1203_v59 }
 0x2ca   : > { %v675_v60 = vpop.xlane.xlu0 %674 }
 0x2cb   : > { %982 = vrcp.f32 %v675_v60 }
 0x2ce   : > { %v677_v61 = vpop.xlane.xlu1 %676  ;;  %v671_v62 = vpop.xlane.xlu0 %670 }
 0x2cf   : > { %984 = vrcp.f32 %v677_v61 }
 0x2d0   : > { %986 = vrcp.f32 %v671_v62 }
 0x2d2   : > { %v673_v63 = vpop.xlane.xlu1 %672 }
 0x2d3   : > { %988 = vrcp.f32 %v673_v63 }
 0x2d4   : > { %v683_v0 = vpop.xlane.xlu0 %682 }
 0x2d5   : > { %990 = vrcp.f32 %v683_v0 }
 0x2d6   : > { %v685_v1 = vpop.xlane.xlu1 %684 }
 0x2d7   : > { %992 = vrcp.f32 %v685_v1 }
 0x2d8   : > { %v983_v2 = vpop.eup %982  ;;  %v679_v3 = vpop.xlane.xlu0 %678 }
 0x2d9   : > { %v707_v4 = vmul.f32 %v983_v2, %v1151_v19  ;;  %994 = vrcp.f32 %v679_v3 }
 0x2da   : > { %v681_v5 = vpop.xlane.xlu1 %680 }
 0x2db   : > { %737 = vst.msk [vmem:[%s1211_s28 + $0x10] sm:$0xff] %vm734_vm1, %v707_v4  ;;  %996 = vrcp.f32 %v681_v5 }
 0x2dc   : > { %v985_v6 = vpop.eup %984  ;;  %v691_v7 = vpop.xlane.xlu0 %690 }
 0x2dd   : > { %v987_v8 = vpop.eup %986  ;;  %v709_v9 = vmul.f32 %v985_v6, %v1157_v27  ;;  %998 = vrcp.f32 %v691_v7 }
 0x2de   : > { %v703_v10 = vmul.f32 %v987_v8, %v1154_v24  ;;  %v693_v11 = vpop.xlane.xlu1 %692 }
 0x2df   : > { %738 = vst.msk [vmem:[%s1211_s28 + $0x18] sm:$0xff] %vm734_vm1, %v709_v9  ;;  %1000 = vrcp.f32 %v693_v11 }
 0x2e0   : > { %v989_v12 = vpop.eup %988  ;;  %735 = vst.msk [vmem:[%s1211_s28] sm:$0xff] %vm734_vm1, %v703_v10  ;;  %v687_v13 = vpop.xlane.xlu0 %686 }
 0x2e1   : > { %v705_v14 = vmul.f32 %v989_v12, %v1163_v34  ;;  %1002 = vrcp.f32 %v687_v13 }
 0x2e2   : > { %v991_v15 = vpop.eup %990  ;;  %v689_v16 = vpop.xlane.xlu1 %688 }
 0x2e3   : > { %736 = vst.msk [vmem:[%s1211_s28 + $0x8] sm:$0xff] %vm734_vm1, %v705_v14  ;;  %v715_v17 = vmul.f32 %v991_v15, %v1167_v38  ;;  %1004 = vrcp.f32 %v689_v16 }
 0x2e4   : > { %v993_v18 = vpop.eup %992  ;;  %v695_v19 = vpop.xlane.xlu0 %694 }
 0x2e5   : > { %741 = vst.msk [vmem:[%s1211_s28 + $0x30] sm:$0xff] %vm734_vm1, %v715_v17  ;;  %v717_v20 = vmul.f32 %v993_v18, %v1170_v40  ;;  %1006 = vrcp.f32 %v695_v19 }
 0x2e6   : > { %v995_v21 = vpop.eup %994 }
 0x2e7   : > { %742 = vst.msk [vmem:[%s1211_s28 + $0x38] sm:$0xff] %vm734_vm1, %v717_v20  ;;  %v711_v22 = vmul.f32 %v995_v21, %v1175_v45 }
 0x2e8   : > { %v997_v23 = vpop.eup %996  ;;  %v697_v24 = vpop.xlane.xlu1 %696 }
 0x2e9   : > { %739 = vst.msk [vmem:[%s1211_s28 + $0x20] sm:$0xff] %vm734_vm1, %v711_v22  ;;  %v713_v25 = vmul.f32 %v997_v23, %v1178_v48  ;;  %1008 = vrcp.f32 %v697_v24  ;;  %v699_v26 = vpop.xlane.xlu0 %698 }
 0x2ea   : > { %v999_v27 = vpop.eup %998  ;;  %1010 = vrcp.f32 %v699_v26 }
 0x2eb   : > { %740 = vst.msk [vmem:[%s1211_s28 + $0x28] sm:$0xff] %vm734_vm1, %v713_v25  ;;  %v723_v28 = vmul.f32 %v999_v27, %v1182_v51 }
 0x2ec   : > { %v1001_v29 = vpop.eup %1000  ;;  %v701_v30 = vpop.xlane.xlu1 %700 }
 0x2ed   : > { %745 = vst.msk [vmem:[%s1211_s28 + $0x50] sm:$0xff] %vm734_vm1, %v723_v28  ;;  %v725_v31 = vmul.f32 %v1001_v29, %v1185_v53  ;;  %1012 = vrcp.f32 %v701_v30 }
 0x2ee   : > { %v1003_v32 = vpop.eup %1002 }
 0x2ef   : > { %746 = vst.msk [vmem:[%s1211_s28 + $0x58] sm:$0xff] %vm734_vm1, %v725_v31  ;;  %v719_v33 = vmul.f32 %v1003_v32, %v1188_v54 }
 0x2f0   : > { %v1005_v34 = vpop.eup %1004 }
 0x2f1   : > { %743 = vst.msk [vmem:[%s1211_s28 + $0x40] sm:$0xff] %vm734_vm1, %v719_v33  ;;  %v721_v35 = vmul.f32 %v1005_v34, %v1191_v55 }
 0x2f2   : > { %v1007_v36 = vpop.eup %1006 }
 0x2f3   : > { %744 = vst.msk [vmem:[%s1211_s28 + $0x48] sm:$0xff] %vm734_vm1, %v721_v35  ;;  %v727_v37 = vmul.f32 %v1007_v36, %v1194_v56 }
 0x2f5   : > { %747 = vst.msk [vmem:[%s1211_s28 + $0x60] sm:$0xff] %vm734_vm1, %v727_v37 }
 0x2f6   : > { %v1009_v38 = vpop.eup %1008 }
 0x2f7   : > { %v1011_v39 = vpop.eup %1010  ;;  %v729_v40 = vmul.f32 %v1009_v38, %v1197_v57 }
 0x2f8   : > { %v731_v41 = vmul.f32 %v1011_v39, %v1199_v58 }
 0x2f9   : > { %748 = vst.msk [vmem:[%s1211_s28 + $0x68] sm:$0xff] %vm734_vm1, %v729_v40 }
 0x2fa   : > { %v1013_v42 = vpop.eup %1012  ;;  %749 = vst.msk [vmem:[%s1211_s28 + $0x70] sm:$0xff] %vm734_vm1, %v731_v41 }
 0x2fb   : > { %v733_v43 = vmul.f32 %v1013_v42, %v1203_v59 }
 0x2fd   : > { %750 = vst.msk [vmem:[%s1211_s28 + $0x78] sm:$0xff] %vm734_vm1, %v733_v43 }
 0x2fe PF: > { %s15_s18 = sadd.s32 1, %s1020_s18  }
 0x2ff   : > { %p12_p4 = scmp.ge.s32.totalorder %s15_s18, 4  }
 0x301   :  { %14 = sbr.rel (!%p12_p4) target bundleno = 1 (0x1), region = 70 }

</bundles_post_ra>
